<compile_context>
chip_gen: v7x
topology: tpu7x:2x2x1
jax: 0.10.0
libtpu: 0.0.40
codegen_flags: <defaults>
</compile_context>

<pallas_src>
import functools

import jax
import jax.numpy as jnp
import numpy as np
from jax.experimental import pallas as pl
from jax.experimental.pallas import tpu as pltpu


def _round_up(x, m):
    return ((x + m - 1) // m) * m


def _router_partial_kernel(logits_ref, counts_ref, probs_ref, *,
                           num_experts, top_k, token_tile, total_tokens,
                           needs_mask):
    """Accumulate per-expert top-k counts and routing-prob sums for one tile.

    logits_ref:  (E, token_tile) block — experts on sublanes, tokens on lanes.
    counts_ref / probs_ref: (1, E, 1) output blocks, resident across the
    token (arbitrary) grid axis -> act as per-parallel-slice accumulators.
    """
    p = pl.program_id(0)            # parallel slice (megacore on v7x)
    s = pl.program_id(1)            # token-tile step within the slice

    @pl.when(s == 0)
    def _():
        counts_ref[...] = jnp.zeros_like(counts_ref)
        probs_ref[...] = jnp.zeros_like(probs_ref)

    x = logits_ref[...].astype(jnp.float32)              # (E, TM)

    # softmax over experts (sublane axis)
    m = jnp.max(x, axis=0, keepdims=True)                # (1, TM)
    ex = jnp.exp(x - m)
    denom = jnp.sum(ex, axis=0, keepdims=True)
    w = ex * pl.reciprocal(denom, approx=False)          # routing weights

    # top-k membership mask via iterative argmax on the raw logits (softmax is
    # monotone, so the selected set is identical). top_k is a small static int
    # -> the Python loop unrolls. Ties break toward the lower expert index,
    # matching jax.lax.top_k / torch.topk ordering for ties.
    sub_idx = jax.lax.broadcasted_iota(jnp.int32, x.shape, 0)
    mask = jnp.zeros_like(x)
    xx = x
    mx = m                                               # reuse softmax max
    for t in range(top_k):
        if t > 0:
            mx = jnp.max(xx, axis=0, keepdims=True)
        is_max = xx == mx
        first = jnp.min(jnp.where(is_max, sub_idx, num_experts),
                        axis=0, keepdims=True)
        sel = (sub_idx == first).astype(jnp.float32)
        mask = mask + sel
        xx = jnp.where(sel > 0.0, -jnp.inf, xx)

    if needs_mask:
        # zero out contributions from padded tokens (only when T was padded)
        tok = (jax.lax.broadcasted_iota(jnp.int32, x.shape, 1)
               + (p * pl.num_programs(1) + s) * token_tile)
        valid = (tok < total_tokens).astype(jnp.float32)
        mask = mask * valid
        w = w * valid

    counts_ref[...] += jnp.sum(mask, axis=1, keepdims=True)[None]   # (1, E, 1)
    probs_ref[...] += jnp.sum(w, axis=1, keepdims=True)[None]       # (1, E, 1)


def mixtral_router_loss(gate_logits, *, num_experts, top_k, aux_loss_coef,
                        token_tile=8192, n_parallel=2):
    """gate_logits: list of [tokens_i, num_experts] arrays (one per layer)."""
    # Lane-dense concat: [E, T_total] with tokens on the fast (lane) axis.
    # The transpose rides along with the concat copy (one HBM pass); native
    # dtype is preserved (no f32 upcast) to minimize HBM traffic.
    logits_t = jnp.concatenate([jnp.transpose(g) for g in gate_logits], axis=1)
    e, total_tokens = logits_t.shape
    assert e == num_experts

    per_slice = pl.cdiv(total_tokens, n_parallel)
    tile = max(128, min(token_tile, _round_up(per_slice, 128)))
    steps = pl.cdiv(per_slice, tile)
    t_pad = n_parallel * steps * tile
    if t_pad != total_tokens:
        logits_t = jnp.pad(logits_t, ((0, 0), (0, t_pad - total_tokens)))

    kernel = functools.partial(
        _router_partial_kernel,
        num_experts=num_experts,
        top_k=top_k,
        token_tile=tile,
        total_tokens=total_tokens,
        needs_mask=(t_pad != total_tokens),
    )

    counts, probs = pl.pallas_call(
        kernel,
        out_shape=(
            jax.ShapeDtypeStruct((n_parallel, num_experts, 1), jnp.float32),
            jax.ShapeDtypeStruct((n_parallel, num_experts, 1), jnp.float32),
        ),
        grid_spec=pltpu.PrefetchScalarGridSpec(
            num_scalar_prefetch=0,
            grid=(n_parallel, steps),
            in_specs=[pl.BlockSpec((num_experts, tile),
                                   lambda p, s: (0, p * steps + s))],
            out_specs=(
                pl.BlockSpec((1, num_experts, 1), lambda p, s: (p, 0, 0)),
                pl.BlockSpec((1, num_experts, 1), lambda p, s: (p, 0, 0)),
            ),
        ),
        compiler_params=pltpu.CompilerParams(
            dimension_semantics=("parallel", "arbitrary"),
        ),
    )(logits_t)

    # Tiny final combine in the wrapper so the parallel slices stay independent.
    inv_t = 1.0 / float(total_tokens)
    tokens_per_expert = counts.sum(axis=0)[:, 0] * inv_t        # f_e
    router_prob_per_expert = probs.sum(axis=0)[:, 0] * inv_t    # p_e
    loss = jnp.sum(tokens_per_expert * router_prob_per_expert)
    return loss * float(num_experts) * float(aux_loss_coef)


def _reference_loss(gate_logits, num_experts, top_k, aux_loss_coef):
    logits = jnp.concatenate([g.astype(jnp.float32) for g in gate_logits], axis=0)
    rw = jax.nn.softmax(logits, axis=-1)
    _, sel = jax.lax.top_k(rw, top_k)
    expert_mask = jax.nn.one_hot(sel, num_experts)              # (T, K, E)
    tokens_per_expert = jnp.mean(expert_mask, axis=0)           # (K, E)
    router_prob_per_expert = jnp.mean(rw, axis=0)               # (E,)
    overall = jnp.sum(tokens_per_expert * router_prob_per_expert[None, :])
    return aux_loss_coef * overall * num_experts


if __name__ == "__main__":
    # MixConfig-like values
    NUM_EXPERTS = 8
    TOP_K = 2
    AUX_LOSS_COEF = 0.001

    key = jax.random.PRNGKey(0)
    k1, k2 = jax.random.split(key)
    k3, k4 = jax.random.split(k2)
    k5, _ = jax.random.split(k4)

    # case 1: two layers of 128 tokens each, f32 (tile-aligned path)
    gl_aligned = [
        jax.random.normal(k1, (128, NUM_EXPERTS), dtype=jnp.float32),
        jax.random.normal(k2, (128, NUM_EXPERTS), dtype=jnp.float32),
    ]

    # case 2: uneven layer lengths in bf16 (padding + native-dtype path)
    gl_padded = [
        jax.random.normal(k3, (96, NUM_EXPERTS), dtype=jnp.float32).astype(jnp.bfloat16),
        jax.random.normal(k4, (80, NUM_EXPERTS), dtype=jnp.float32).astype(jnp.bfloat16),
    ]

    # case 3: multi-step token axis + masked tail (exercises the accumulator
    # across the "arbitrary" grid axis with a small token_tile)
    gl_multistep = [
        jax.random.normal(k5, (640, NUM_EXPERTS), dtype=jnp.float32),
    ]

    cases = [
        (gl_aligned, {}),
        (gl_padded, {}),
        (gl_multistep, {"token_tile": 128}),
    ]

    for gl, kwargs in cases:
        loss = mixtral_router_loss(
            gl,
            num_experts=NUM_EXPERTS,
            top_k=TOP_K,
            aux_loss_coef=AUX_LOSS_COEF,
            **kwargs,
        )
        loss = jax.block_until_ready(loss)
        ref = _reference_loss(gl, NUM_EXPERTS, TOP_K, AUX_LOSS_COEF)
        np.testing.assert_allclose(np.asarray(loss), np.asarray(ref),
                                   rtol=1e-5, atol=1e-6)

    print("KERNEL_OK")
</pallas_src>

<mosaic_0001>
module attributes {stable_mosaic.version = 11 : i64} {
  func.func @_router_partial_kernel(%arg0: i32, %arg1: i32, %arg2: memref<8x128xf32, #tpu.memory_space<vmem>>, %arg3: memref<1x8x1xf32, #tpu.memory_space<vmem>>, %arg4: memref<1x8x1xf32, #tpu.memory_space<vmem>>) attributes {dimension_semantics = [#tpu.dimension_semantics<parallel>, #tpu.dimension_semantics<arbitrary>], iteration_bounds = array<i64: 2, 1>, scalar_prefetch = 0 : i64, scratch_operands = 0 : i64, tpu.core_type = #tpu.core_type<tc>, window_params = [{transform_indices = @transform_0, window_bounds = array<i64: 8, 128>}, {transform_indices = @transform_1, window_bounds = array<i64: 1, 8, 1>}, {transform_indices = @transform_2, window_bounds = array<i64: 1, 8, 1>}]} {
    %c0_i32 = arith.constant 0 : i32
    %0 = arith.cmpi eq, %arg1, %c0_i32 : i32
    %1 = arith.extui %0 : i1 to i32
    %c0_i32_0 = arith.constant 0 : i32
    %2 = arith.cmpi ne, %1, %c0_i32_0 : i32
    scf.if %2 {
      %cst_24 = arith.constant 0.000000e+00 : f32
      %56 = vector.broadcast %cst_24 : f32 to vector<1x8x1xf32>
      %c0_25 = arith.constant 0 : index
      %c0_26 = arith.constant 0 : index
      %c0_27 = arith.constant 0 : index
      %57 = vector.load %arg3[%c0_25, %c0_26, %c0_27] : memref<1x8x1xf32, #tpu.memory_space<vmem>>, vector<1x8x1xf32>
      tpu.vector_store %arg3[%c0_25, %c0_26, %c0_27], %56 {strides = array<i32>} : memref<1x8x1xf32, #tpu.memory_space<vmem>>, vector<1x8x1xf32>,
      %cst_28 = arith.constant 0.000000e+00 : f32
      %58 = vector.broadcast %cst_28 : f32 to vector<1x8x1xf32>
      %c0_29 = arith.constant 0 : index
      %c0_30 = arith.constant 0 : index
      %c0_31 = arith.constant 0 : index
      %59 = vector.load %arg4[%c0_29, %c0_30, %c0_31] : memref<1x8x1xf32, #tpu.memory_space<vmem>>, vector<1x8x1xf32>
      tpu.vector_store %arg4[%c0_29, %c0_30, %c0_31], %58 {strides = array<i32>} : memref<1x8x1xf32, #tpu.memory_space<vmem>>, vector<1x8x1xf32>,
    } else {
    }
    %c0 = arith.constant 0 : index
    %c0_1 = arith.constant 0 : index
    %3 = vector.load %arg2[%c0, %c0_1] : memref<8x128xf32, #tpu.memory_space<vmem>>, vector<8x128xf32>
    %cst = arith.constant dense<0xFF800000> : vector<128xf32>
    %4 = vector.multi_reduction <maximumf>, %3, %cst [0] : vector<8x128xf32> to vector<128xf32>
    %5 = vector.shape_cast %4 : vector<128xf32> to vector<1x128xf32>
    %6 = vector.broadcast %5 : vector<1x128xf32> to vector<8x128xf32>
    %7 = arith.subf %3, %6 : vector<8x128xf32>
    %8 = math.exp %7 : vector<8x128xf32>
    %cst_2 = arith.constant dense<0.000000e+00> : vector<128xf32>
    %9 = vector.multi_reduction <add>, %8, %cst_2 [0] : vector<8x128xf32> to vector<128xf32>
    %10 = vector.shape_cast %9 : vector<128xf32> to vector<1x128xf32>
    %11 = tpu.reciprocal %10 : vector<1x128xf32> -> vector<1x128xf32>
    %12 = vector.broadcast %11 : vector<1x128xf32> to vector<8x128xf32>
    %13 = arith.mulf %8, %12 : vector<8x128xf32>
    %14 = tpu.iota {dimensions = array<i32: 0>} : vector<8x128xi32>
    %cst_3 = arith.constant 0.000000e+00 : f32
    %15 = vector.broadcast %cst_3 : f32 to vector<8x128xf32>
    %16 = vector.broadcast %5 : vector<1x128xf32> to vector<8x128xf32>
    %17 = arith.cmpf oeq, %3, %16 : vector<8x128xf32>
    %c8_i32 = arith.constant 8 : i32
    %18 = vector.broadcast %c8_i32 : i32 to vector<8x128xi32>
    %19 = arith.select %17, %14, %18 : vector<8x128xi1>, vector<8x128xi32>
    %cst_4 = arith.constant dense<2147483647> : vector<128xi32>
    %20 = vector.multi_reduction <minsi>, %19, %cst_4 [0] : vector<8x128xi32> to vector<128xi32>
    %21 = vector.shape_cast %20 : vector<128xi32> to vector<1x128xi32>
    %22 = vector.broadcast %21 : vector<1x128xi32> to vector<8x128xi32>
    %23 = arith.cmpi eq, %14, %22 : vector<8x128xi32>
    %24 = arith.extui %23 : vector<8x128xi1> to vector<8x128xi32>
    %25 = arith.sitofp %24 : vector<8x128xi32> to vector<8x128xf32>
    %26 = arith.addf %15, %25 : vector<8x128xf32>
    %cst_5 = arith.constant 0.000000e+00 : f32
    %27 = vector.broadcast %cst_5 : f32 to vector<8x128xf32>
    %28 = arith.cmpf ogt, %25, %27 : vector<8x128xf32>
    %cst_6 = arith.constant 0xFF800000 : f32
    %29 = vector.broadcast %cst_6 : f32 to vector<8x128xf32>
    %30 = arith.select %28, %29, %3 : vector<8x128xi1>, vector<8x128xf32>
    %cst_7 = arith.constant dense<0xFF800000> : vector<128xf32>
    %31 = vector.multi_reduction <maximumf>, %30, %cst_7 [0] : vector<8x128xf32> to vector<128xf32>
    %32 = vector.shape_cast %31 : vector<128xf32> to vector<1x128xf32>
    %33 = vector.broadcast %32 : vector<1x128xf32> to vector<8x128xf32>
    %34 = arith.cmpf oeq, %30, %33 : vector<8x128xf32>
    %c8_i32_8 = arith.constant 8 : i32
    %35 = vector.broadcast %c8_i32_8 : i32 to vector<8x128xi32>
    %36 = arith.select %34, %14, %35 : vector<8x128xi1>, vector<8x128xi32>
    %cst_9 = arith.constant dense<2147483647> : vector<128xi32>
    %37 = vector.multi_reduction <minsi>, %36, %cst_9 [0] : vector<8x128xi32> to vector<128xi32>
    %38 = vector.shape_cast %37 : vector<128xi32> to vector<1x128xi32>
    %39 = vector.broadcast %38 : vector<1x128xi32> to vector<8x128xi32>
    %40 = arith.cmpi eq, %14, %39 : vector<8x128xi32>
    %41 = arith.extui %40 : vector<8x128xi1> to vector<8x128xi32>
    %42 = arith.sitofp %41 : vector<8x128xi32> to vector<8x128xf32>
    %43 = arith.addf %26, %42 : vector<8x128xf32>
    %c0_10 = arith.constant 0 : index
    %c0_11 = arith.constant 0 : index
    %c0_12 = arith.constant 0 : index
    %44 = vector.load %arg3[%c0_10, %c0_11, %c0_12] : memref<1x8x1xf32, #tpu.memory_space<vmem>>, vector<1x8x1xf32>
    %cst_13 = arith.constant dense<0.000000e+00> : vector<8xf32>
    %45 = vector.multi_reduction <add>, %43, %cst_13 [1] : vector<8x128xf32> to vector<8xf32>
    %46 = vector.shape_cast %45 : vector<8xf32> to vector<8x1xf32>
    %47 = vector.shape_cast %46 : vector<8x1xf32> to vector<1x8x1xf32>
    %48 = arith.addf %44, %47 : vector<1x8x1xf32>
    %c0_14 = arith.constant 0 : index
    %c0_15 = arith.constant 0 : index
    %c0_16 = arith.constant 0 : index
    %49 = vector.load %arg3[%c0_14, %c0_15, %c0_16] : memref<1x8x1xf32, #tpu.memory_space<vmem>>, vector<1x8x1xf32>
    tpu.vector_store %arg3[%c0_14, %c0_15, %c0_16], %48 {strides = array<i32>} : memref<1x8x1xf32, #tpu.memory_space<vmem>>, vector<1x8x1xf32>,
    %c0_17 = arith.constant 0 : index
    %c0_18 = arith.constant 0 : index
    %c0_19 = arith.constant 0 : index
    %50 = vector.load %arg4[%c0_17, %c0_18, %c0_19] : memref<1x8x1xf32, #tpu.memory_space<vmem>>, vector<1x8x1xf32>
    %cst_20 = arith.constant dense<0.000000e+00> : vector<8xf32>
    %51 = vector.multi_reduction <add>, %13, %cst_20 [1] : vector<8x128xf32> to vector<8xf32>
    %52 = vector.shape_cast %51 : vector<8xf32> to vector<8x1xf32>
    %53 = vector.shape_cast %52 : vector<8x1xf32> to vector<1x8x1xf32>
    %54 = arith.addf %50, %53 : vector<1x8x1xf32>
    %c0_21 = arith.constant 0 : index
    %c0_22 = arith.constant 0 : index
    %c0_23 = arith.constant 0 : index
    %55 = vector.load %arg4[%c0_21, %c0_22, %c0_23] : memref<1x8x1xf32, #tpu.memory_space<vmem>>, vector<1x8x1xf32>
    tpu.vector_store %arg4[%c0_21, %c0_22, %c0_23], %54 {strides = array<i32>} : memref<1x8x1xf32, #tpu.memory_space<vmem>>, vector<1x8x1xf32>,
    return
  }
  func.func @transform_0(%arg0: i32, %arg1: i32) -> (i32, i32) {
    %c1_i32 = arith.constant 1 : i32
    %0 = arith.muli %arg0, %c1_i32 : i32
    %1 = arith.addi %0, %arg1 : i32
    %c0_i32 = arith.constant 0 : i32
    %c0_i32_0 = arith.constant 0 : i32
    return %c0_i32, %1 : i32, i32
  }
  func.func @transform_1(%arg0: i32, %arg1: i32) -> (i32, i32, i32) {
    %c0_i32 = arith.constant 0 : i32
    %c0_i32_0 = arith.constant 0 : i32
    %c0_i32_1 = arith.constant 0 : i32
    return %arg0, %c0_i32, %c0_i32_0 : i32, i32, i32
  }
  func.func @transform_2(%arg0: i32, %arg1: i32) -> (i32, i32, i32) {
    %c0_i32 = arith.constant 0 : i32
    %c0_i32_0 = arith.constant 0 : i32
    %c0_i32_1 = arith.constant 0 : i32
    return %arg0, %c0_i32, %c0_i32_0 : i32, i32, i32
  }
}

</mosaic_0001>

<bundles_post_ra>
// kernel: tpu_custom_call.1
= control target key start
LH: loop header
LB: loop body
LE: loop exit
PB: predicated region body
PF: predicated region fallthrough
CT: control target
= control target key end

     0   :  { %8 = vsyncpa [#allocation3], 0  ;;  %s684_s0 = inlined_call_operand.hbm [shape: f32[8,256], index: 0, kind: input, shape index: {}]   ;;  %s685_s1 = inlined_call_operand.vmem [shape: f32[2,8,1], index: 1, kind: output, shape index: {0}]   ;;  %s686_s2 = inlined_call_operand.vmem [shape: f32[2,8,1], index: 2, kind: output, shape index: {1}]  }
   0x1   :  { %10 = vsyncpa [#allocation3 + $0x1], 0  ;;  %s540_s9 = smov 0   ;;  %s542_s10 = smov 0  }
   0x2   :  { %s544_s11 = smov 0   ;;  %s546_s12 = smov 0  }
   0x3   :  { %s548_s13 = smov 0   ;;  %s550_s14 = smov 0  }
   0x4 LB: > { %s367_s15 = sadd.s32 4294967295, %s521_s14   ;;  %s28_s16 = sadd.s32 1, %s517_s13  ;;  %s521_s14 = sphi %s550_s14, %s16_s14   ;;  %s517_s13 = sphi %s548_s13, %s696_s13   ;;  %s513_s12 = sphi %s546_s12, %s695_s12   ;;  %s509_s11 = sphi %s544_s11, %s694_s11   ;;  %s505_s10 = sphi %s542_s10, %s693_s10   ;;  %s501_s9 = sphi %s540_s9, %s692_s9  }
   0x5   : > { %p30_p0 = scmp.ge.s32.totalorder %s28_s16, 2  ;;  %s37_s17 = sadd.s32 1, %s509_s11 }
   0x6   : > { %p44_p1 = scmp.ne.s32.totalorder %s509_s11, %s505_s10  ;;  %p45_p2 = scmp.eq.s32.totalorder %s521_s14, 0 }
   0x7   : > { %s698_s16 = smov (%p30_p0, %s28_s16), 0  ;;  %p50_p4 = scmp.ne.s32.totalorder %s505_s10, %s501_s9 }
   0x8   : > { %p576_p3 = por %p45_p2, %p44_p1  ;;  %s34_s19 = ssub.s32 %s517_s13, %s698_s16 }
   0x9   : > { %p51_p5 = scmp.eq.s32.totalorder %s367_s15, 0  ;;  %p35_p6 = scmp.eq.s32.totalorder %s34_s19, 0 }
   0xa   : > { %p387_p8 = scmp.lt.s32.totalorder %s521_s14, 2  ;;  %s126_s22 = sand.u32 1, %s509_s11  }
   0xb   : > { %p583_p7 = por %p51_p5, %p50_p4  ;;  %s372_s23 = sshll.u32 %s517_s13, 7 }
   0xc   : > { %s589_s21 = scalar_select %p35_p6, %s509_s11, %s37_s17  }
   0xd   : > { %s371_s24 = sshll.u32 %s126_s22, 3  ;;  %s596_s27 = scalar_lea.hbm %s684_s0, %s372_s23 }
   0xe   : > { %s130_s28 = scalar_lea.vmem [#allocation2], %s371_s24  ;;  %p600_p9 = pnand %p387_p8, %p576_p3 }
   0xf   : > { %s138_s29 = sshll.u32 %s130_s28, 4  ;;  %s127_s3 = scalar_lea.sflag [#allocation3], %s126_s22  ;;  %s604_s29 = int_to_ptr.vmem [resolvable:$true] %s138_s29 }
  0x10   : > { %s441_s4 = scalar_lea.hbm %s596_s27, 128  ;;  %p443_p13 = pneg %p600_p9 }
  0x11   : > { %p442_p12 = scmp.ne.s32.totalorder %s596_s27, %s441_s4  ;;  %s446_s7 = scalar_lea.hbm %s684_s0, 256 }
  0x12   : > { %p447_p2 = scmp.lt.u32.totalorder %s596_s27, %s684_s0  ;;  %p448_p3 = scmp.lt.u32.totalorder %s446_s7, %s441_s4 }
  0x13   : > { %p444_p0 = pnand %p443_p13, %p442_p12  ;;  %p450_p5 = scmp.lt.u32.totalorder %s441_s4, %s596_s27 }
  0x14   : > { %p449_p4 = por %p448_p3, %p447_p2 }
  0x15   : > { %p445_p1 = pneg %p444_p0 }
  0x16   : > { %p451_p6 = por %p450_p5, %p449_p4 }
  0x18   : > { %p452_p8 = pnand %p451_p6, %p445_p1 }
  0x1a   : > { %455 = shalt.err (!%p452_p8)
}
  0x1b   : > { %s456_s15 = scalar_lea.vmem %s604_s29, 128  ;;  %s523_s17 = smov [#allocation2]  }
  0x1c   : > { %p457_p12 = scmp.ne.s32.totalorder %s604_s29, %s456_s15  ;;  %s461_s18 = sshll.u32 %s523_s17, 4  ;;  %s462_s18 = int_to_ptr.vmem [resolvable:$false] %s461_s18 }
  0x1d   : > { %s463_s19 = scalar_lea.vmem %s462_s18, 256  ;;  %p464_p11 = scmp.lt.s32.totalorder %s604_s29, %s462_s18 }
  0x1e   : > { %p459_p0 = pnand %p457_p12, %p443_p13  ;;  %p465_p2 = scmp.lt.s32.totalorder %s463_s19, %s456_s15 }
  0x20   : > { %p460_p10 = pneg %p459_p0  ;;  %p466_p3 = por %p465_p2, %p464_p11 }
  0x22   : > { %p467_p4 = pnand %p466_p3, %p460_p10 }
  0x24   : > { %470 = shalt.err (!%p467_p4)
}
  0x25   : > { %386 = dma.hbm_to_vmem [thread:$0]  (!%p600_p9), %s596_s27, 128, %s604_s29, %s127_s3  }
  0x26   : > { %p690_p1 = scmp.lt.s32.totalorder %s521_s14, 3  ;;  %p691_p5 = scmp.ge.s32.totalorder %s521_s14, 1 }
  0x28   : > { %p144_p13 = pnand %p691_p5, %p690_p1 }
  0x29   : > { %s149_s22 = sand.u32 (!%p144_p13), 1, %s505_s10  }
  0x2a   : > { %147 = sbr.rel (%p144_p13) target bundleno = 260 (0x104), region = 24  ;;  %s374_s23 = sshll.u32 (!%p144_p13), %s149_s22, 3 }
  0x2b   : > { %s150_s24 = scalar_lea.sflag (!%p144_p13), [#allocation3], %s149_s22  ;;  %s153_s25 = scalar_lea.vmem (!%p144_p13), [#allocation2], %s374_s23 }
  0x31   : > { %496 = dma.done.wait (%p583_p7), %s150_s24, 128  }
  0x32   : > { %498 = vsyncadd (%p583_p7), %s150_s24, 4294967168  ;;  %p178_p10 = scmp.lt.s32.totalorder %s513_s12, 1  ;;  %vm190_vm0 = vcmask 7168   ;;  %v524_v0 = vmov 0.0   ;;  %v193_v1 = vld [vmem:[%s153_s25] sm:$0xff]  ;;  %v211_v5 = vlaneseq }
  0x33   : > { %v194_v2 = vrot.slane %v193_v1, 4 }
  0x34   : > { %s700_s12 = smov (!%p178_p10, %s513_s12), 1  ;;  %v212_v8 = vshrl.u32 %v211_v5, 7 }
  0x35   : > { %s375_s26 = sshll.u32 %s700_s12, 3  ;;  %v195_v3 = vmax.f32 %v193_v1, %v194_v2 }
  0x36   : > { %s652_s29 = scalar_lea.vmem %s685_s1, %s375_s26  ;;  %s185_s3 = scalar_lea.vmem %s686_s2, %s375_s26 }
  0x37   : > { %191 = vst.msk [vmem:[%s652_s29] sm:$0xff] %vm190_vm0, %v524_v0  ;;  %v196_v4 = vrot.slane %v195_v3, 2  ;;  %192 = vst.msk [vmem:[%s185_s3] sm:$0xff] %vm190_vm0, %v524_v0 }
  0x39   : > { %v197_v6 = vmax.f32 %v195_v3, %v196_v4 }
  0x3b   : > { %v198_v7 = vrot.slane %v197_v6, 1 }
  0x3d   : > { %v199_v9 = vmax.f32 %v197_v6, %v198_v7 }
  0x3e   : > { %v251_v45 = vld [vmem:[%s652_s29] sm:$0xff] }
  0x3f   : > { %vm213_vm1 = vcmp.eq.f32.partialorder %v193_v1, %v199_v9  ;;  %v200_v10 = vsub.f32 %v193_v1, %v199_v9  ;;  %v257_v48 = vld [vmem:[%s185_s3] sm:$0xff] }
  0x40   : > { %v214_v11 = vsel %vm213_vm1, %v212_v8, 8 }
  0x41   : > { %v215_v12 = vrot.slane %v214_v11, 4  ;;  %v201_v13 = vmul.f32 1.442695, %v200_v10 }
  0x43   : > { %vm216_vm2 = vcmp.lt.s32.totalorder %v214_v11, %v215_v12  ;;  %437 = vpow2.f32 %v201_v13 }
  0x44   : > { %v217_v14 = vsel %vm216_vm2, %v214_v11, %v215_v12 }
  0x45   : > { %v218_v15 = vrot.slane %v217_v14, 2 }
  0x47   : > { %vm219_vm3 = vcmp.lt.s32.totalorder %v217_v14, %v218_v15 }
  0x48   : > { %v220_v16 = vsel %vm219_vm3, %v217_v14, %v218_v15 }
  0x49   : > { %v221_v17 = vrot.slane %v220_v16, 1 }
  0x4b   : > { %vm222_vm4 = vcmp.lt.s32.totalorder %v220_v16, %v221_v17 }
  0x4c   : > { %v223_v18 = vsel %vm222_vm4, %v220_v16, %v221_v17 }
  0x4d   : > { %v438_v19 = vpop.eup %437  ;;  %vm224_vm5 = vcmp.eq.s32.totalorder %v212_v8, %v223_v18 }
  0x4e   : > { %v377_v20 = vsel %vm224_vm5, 1.0, %v524_v0  ;;  %v203_v21 = vrot.slane %v438_v19, 4 }
  0x4f   : > { %vm228_vm6 = vcmp.gt.f32.partialorder %v377_v20, 0.0 }
  0x50   : > { %v229_v22 = vsel %vm228_vm6, -inf, %v193_v1  ;;  %v204_v23 = vadd.f32 %v438_v19, %v203_v21 }
  0x51   : > { %v230_v24 = vrot.slane %v229_v22, 4 }
  0x52   : > { %v205_v25 = vrot.slane %v204_v23, 2 }
  0x53   : > { %v231_v26 = vmax.f32 %v229_v22, %v230_v24 }
  0x54   : > { %v206_v28 = vadd.f32 %v205_v25, %v204_v23 }
  0x55   : > { %v232_v27 = vrot.slane %v231_v26, 2 }
  0x56   : > { %v207_v31 = vrot.slane %v206_v28, 1 }
  0x57   : > { %v233_v29 = vmax.f32 %v231_v26, %v232_v27 }
  0x58   : > { %v208_v34 = vadd.f32 %v207_v31, %v206_v28 }
  0x59   : > { %v234_v30 = vrot.slane %v233_v29, 1 }
  0x5a   : > { %439 = vrcp.f32 %v208_v34 }
  0x5b   : > { %v235_v32 = vmax.f32 %v233_v29, %v234_v30 }
  0x5d   : > { %vm236_vm7 = vcmp.eq.f32.partialorder %v229_v22, %v235_v32 }
  0x5e   : > { %v237_v33 = vsel %vm236_vm7, %v212_v8, 8 }
  0x5f   : > { %v238_v35 = vrot.slane %v237_v33, 4 }
  0x61   : > { %vm239_vm8 = vcmp.lt.s32.totalorder %v237_v33, %v238_v35 }
  0x62   : > { %v240_v36 = vsel %vm239_vm8, %v237_v33, %v238_v35 }
  0x63   : > { %v241_v37 = vrot.slane %v240_v36, 2 }
  0x64   : > { %v440_v41 = vpop.eup %439 }
  0x65   : > { %vm242_vm9 = vcmp.lt.s32.totalorder %v240_v36, %v241_v37  ;;  %v210_v44 = vmul.f32 %v440_v41, %v438_v19 }
  0x66   : > { %v243_v38 = vsel %vm242_vm9, %v240_v36, %v241_v37 }
  0x67   : > { %v244_v39 = vrot.slane %v243_v38, 1 }
  0x69   : > { %vm245_vm10 = vcmp.lt.s32.totalorder %v243_v38, %v244_v39 }
  0x6a   : > { %v246_v40 = vsel %vm245_vm10, %v243_v38, %v244_v39 }
  0x6b   : > { %vm247_vm11 = vcmp.eq.s32.totalorder %v212_v8, %v246_v40 }
  0x6c   : > { %v378_v42 = vsel %vm247_vm11, 1.0, %v524_v0 }
  0x6d   : > { %v250_v43 = vadd.f32 %v378_v42, %v377_v20 }
  0x6f   : > { %252 = vadd.xlane.f32.xlu0 %v250_v43 }
  0x73   : > { %258 = vadd.xlane.f32.xlu0 %v210_v44 }
  0xfc   : > { %v253_v46 = vpop.xlane.xlu0 %252 }
  0xfd   : > { %v254_v47 = vadd.f32 %v253_v46, %v251_v45 }
  0xff   : > { %256 = vst.msk [vmem:[%s652_s29] sm:$0xff] %vm190_vm0, %v254_v47 }
 0x100   : > { %v259_v49 = vpop.xlane.xlu0 %258 }
 0x101   : > { %v260_v50 = vadd.f32 %v259_v49, %v257_v48 }
 0x103   : > { %261 = vst.msk [vmem:[%s185_s3] sm:$0xff] %vm190_vm0, %v260_v50 }
 0x104 PF: > { %s16_s14 = sadd.s32 1, %s521_s14   ;;  %s692_s9 = smov %s505_s10 }
 0x105   : > { %p13_p7 = scmp.ge.s32.totalorder %s16_s14, 4   ;;  %s693_s10 = smov %s509_s11 }
 0x106   : > { %s694_s11 = smov %s589_s21  ;;  %s695_s12 = smov %s517_s13 }
 0x107   : > { %s696_s13 = smov %s698_s16  ;;  %15 = sbr.rel (!%p13_p7) target bundleno = 4 (0x4), region = 80 }
 0x10e   :  { %295 = vsyncpa [#allocation3], 1 }
 0x10f   :  { %297 = vsyncpa [#allocation3 + $0x1], 1 }

</bundles_post_ra>
